<compile_context>
chip_gen: v7x
topology: tpu7x:2x2x1
jax: 0.10.0
libtpu: 0.0.40
codegen_flags: <defaults>
</compile_context>

<pallas_src>
import functools
import numpy as np

import jax
import jax.numpy as jnp
from jax import lax
from jax.experimental import pallas as pl
from jax.experimental.pallas import tpu as pltpu

EPS = 1e-7
LOG_CLAMP = -100.0  # torch.nn.BCELoss clamps log outputs at -100


def _round_up(x, m):
    return ((x + m - 1) // m) * m


def _default_num_cores():
    # 2 TensorCores per chip only on v7x; v5e/v6e have one, where a 2-way
    # "parallel" axis just serializes and doubles accumulator init/writeback.
    try:
        kind = jax.devices()[0].device_kind.lower()
    except Exception:
        return 1
    return 2 if "7" in kind else 1


def _stats_kernel(pred_ref, tgt_ref,
                  inter_ref, ratio_ref, sumt_ref, sump_ref, suml_ref,
                  *, batch, kch, lp, chunk, steps, ppix):
    """Accumulate pairwise (label, channel) statistics over one pixel chunk.

    pred_ref: (B*K, CHUNK) f32 probabilities (row b*K+k), pixels on lanes.
    tgt_ref:  (B, CHUNK) integer labels (any integer dtype).
    Per-core resident accumulators (outputs revisited along the chunk axis):
      inter_ref: (1, Lp, K)   sum_x t_n * p_k
      ratio_ref: (1, Lp, K)   sum_x t_n * (log p_k - log(1-p_k))
      sumt_ref:  (1, Lp, 1)   sum_x t_n
      sump_ref:  (1, B*K, 1)  sum_x p          (per (b,k) row; reduced in wrapper)
      suml_ref:  (1, B*K, 1)  sum_x log(1-p)   (per (b,k) row; reduced in wrapper)
    """
    c = pl.program_id(0)
    i = pl.program_id(1)

    @pl.when(i == 0)
    def _():
        inter_ref[...] = jnp.zeros_like(inter_ref)
        ratio_ref[...] = jnp.zeros_like(ratio_ref)
        sumt_ref[...] = jnp.zeros_like(sumt_ref)
        sump_ref[...] = jnp.zeros_like(sump_ref)
        suml_ref[...] = jnp.zeros_like(suml_ref)

    # Ragged-tail / core-overshoot mask.  gidx is the *unclamped* global chunk
    # index (the DMA index_map clamps it), so duplicated or partial blocks
    # contribute nothing below.
    gidx = c * steps + i
    base = gidx * chunk
    lane = lax.broadcasted_iota(jnp.int32, (1, chunk), 1)
    valid = (base + lane) < ppix                                    # (1, CHUNK)

    # Dead lanes: p = 0 -> log(1-p) = 0 and log(p) clamps to -100 (finite);
    # label = -1 -> one-hot is 0 there, so they contribute nothing anywhere.
    p = jnp.where(valid, pred_ref[...], 0.0)                        # (B*K, CHUNK)
    tgt = jnp.where(valid, tgt_ref[...].astype(jnp.int32), -1)      # (B, CHUNK)

    # EUP logs on the dense, fully-packed (B*K, CHUNK) slab: full 8-sublane
    # vregs even when K < 8 (binding unit once chunks are large).
    # TODO(synk): on v6e/v7x a bf16 log path is ~2x EUP throughput but perturbs
    #             BCE by ~1e-3 relative; keep f32 for parity with torch.
    log_p = jnp.maximum(jnp.log(p), LOG_CLAMP)
    log_1mp = jnp.maximum(jnp.log(1.0 - p), LOG_CLAMP)
    ratio = log_p - log_1mp     # t*log p + (1-t)*log(1-p) = t*ratio + log(1-p)

    labels = lax.broadcasted_iota(jnp.int32, (lp, chunk), 0)
    dn = (((1,), (1,)), ((), ()))   # contract the pixel (lane) axis of both operands

    inter_c = jnp.zeros((lp, kch), jnp.float32)
    ratio_c = jnp.zeros((lp, kch), jnp.float32)
    sumt_c = jnp.zeros((lp, 1), jnp.float32)
    for b in range(batch):                                          # static, B is tiny
        t_b = (labels == tgt[b:b + 1, :]).astype(jnp.float32)       # (Lp, CHUNK)
        p_b = p[b * kch:(b + 1) * kch, :]                           # (K, CHUNK)
        r_b = ratio[b * kch:(b + 1) * kch, :]
        # TODO(synk): if the bundle shows XLU rhs transposes / vmatmul pushes on
        #             the critical path, concat [p_b; r_b] -> (2K, CHUNK) and
        #             issue a single dot_general per batch.
        inter_c += lax.dot_general(t_b, p_b, dn, preferred_element_type=jnp.float32)
        ratio_c += lax.dot_general(t_b, r_b, dn, preferred_element_type=jnp.float32)
        sumt_c += jnp.sum(t_b, axis=1, keepdims=True)

    inter_ref[0] += inter_c
    ratio_ref[0] += ratio_c
    sumt_ref[0] += sumt_c
    sump_ref[0] += jnp.sum(p, axis=1, keepdims=True)
    suml_ref[0] += jnp.sum(log_1mp, axis=1, keepdims=True)


def _pairwise_stats(pred_flat, tgt_flat, *, batch, kch, lp, chunk, steps,
                    total_chunks, num_cores, ppix):
    bk = batch * kch
    last = total_chunks - 1

    kernel = functools.partial(_stats_kernel, batch=batch, kch=kch, lp=lp,
                               chunk=chunk, steps=steps, ppix=ppix)

    def in_map(c, i):
        # Clamp so no block starts past the array; the kernel masks the
        # duplicated/partial lanes itself using the unclamped index.
        return (0, jnp.minimum(c * steps + i, last))

    out_shape = (
        jax.ShapeDtypeStruct((num_cores, lp, kch), jnp.float32),   # intersections
        jax.ShapeDtypeStruct((num_cores, lp, kch), jnp.float32),   # t . (log p - log(1-p))
        jax.ShapeDtypeStruct((num_cores, lp, 1), jnp.float32),     # sum of one-hot target
        jax.ShapeDtypeStruct((num_cores, bk, 1), jnp.float32),     # sum of p per (b,k) row
        jax.ShapeDtypeStruct((num_cores, bk, 1), jnp.float32),     # sum of log(1-p) per row
    )
    grid_spec = pltpu.PrefetchScalarGridSpec(
        num_scalar_prefetch=0,
        grid=(num_cores, steps),
        in_specs=[
            # TODO(synk): add pipeline_mode=pl.Buffered(3) here only if xprof
            #             still shows exposed DMA after the chunk enlargement.
            pl.BlockSpec((bk, chunk), in_map),
            pl.BlockSpec((batch, chunk), in_map),
        ],
        out_specs=(
            pl.BlockSpec((1, lp, kch), lambda c, i: (c, 0, 0)),
            pl.BlockSpec((1, lp, kch), lambda c, i: (c, 0, 0)),
            pl.BlockSpec((1, lp, 1), lambda c, i: (c, 0, 0)),
            pl.BlockSpec((1, bk, 1), lambda c, i: (c, 0, 0)),
            pl.BlockSpec((1, bk, 1), lambda c, i: (c, 0, 0)),
        ),
    )
    tgt_bytes = tgt_flat.dtype.itemsize
    cost = pl.CostEstimate(
        flops=int(4 * batch * lp * kch * ppix),
        transcendentals=int(2 * batch * kch * ppix),
        bytes_accessed=int(4 * bk * ppix + tgt_bytes * batch * ppix),
    )
    return pl.pallas_call(
        kernel,
        out_shape=out_shape,
        grid_spec=grid_spec,
        compiler_params=pltpu.CompilerParams(
            dimension_semantics=("parallel", "arbitrary"),
            # v5e's default scoped-VMEM limit is only 16 MiB; raise it so the
            # enlarged pixel chunks fit.  32 MiB is safe on v7x (64 MiB phys).
            vmem_limit_bytes=32 * 1024 * 1024,
        ),
        cost_estimate=cost,
    )(pred_flat, tgt_flat)


def connect_loss(pred, target, *, num_candidate_labels, num_cores=None):
    """pred: (B, K, H, W) float probabilities; target: (B, 1, H, W) int labels."""
    if num_cores is None:
        num_cores = _default_num_cores()
    return _connect_loss(pred, target,
                         num_candidate_labels=num_candidate_labels,
                         num_cores=num_cores)


@functools.partial(jax.jit, static_argnames=("num_candidate_labels", "num_cores"))
def _connect_loss(pred, target, *, num_candidate_labels, num_cores):
    b, k, h, w = pred.shape
    ppix = h * w                      # pixels per batch image (lane axis)
    npix = b * ppix                   # total pixels (BCE mean denominator)
    lmax = num_candidate_labels       # candidate labels 0..lmax-1
    lp = _round_up(max(lmax, 1), 8)
    bk = b * k

    # Pixel chunk: as large as the VMEM budget allows (fewer ~0.35us grid
    # steps).  Budget counts the double-buffered inputs, ~4 f32 temporaries of
    # the pred block (p, log p, log(1-p), ratio) and the (Lp, chunk) one-hot.
    bytes_per_lane = 4 * (7 * bk + 2 * b + 2 * lp)
    budget = 24 * 1024 * 1024         # conservative across v5e/v6e/v7x
    max_chunk_budget = max(128, (budget // bytes_per_lane) // 128 * 128)
    chunk = max(128, min(32768, max_chunk_budget,
                         _round_up(pl.cdiv(ppix, num_cores), 128)))
    total_chunks = pl.cdiv(ppix, chunk)
    steps = pl.cdiv(total_chunks, num_cores)

    # Free reshapes only: pixels on the lane axis, batch*channel on sublanes.
    # No transpose, no channel pad, and no wrapper-side jnp.pad of pred
    # (ragged tail is masked in-kernel instead).
    pred_flat = pred.astype(jnp.float32).reshape(bk, ppix)
    tgt_flat = target.reshape(b, ppix)   # keep caller dtype (int8 ok; cast in-kernel)

    inter_c, ratio_c, sumt_c, sump_c, suml_c = _pairwise_stats(
        pred_flat, tgt_flat, batch=b, kch=k, lp=lp, chunk=chunk, steps=steps,
        total_chunks=total_chunks, num_cores=num_cores, ppix=ppix)

    inter = jnp.sum(inter_c, axis=0)[:lmax, :]                     # (L, K)
    ratio_s = jnp.sum(ratio_c, axis=0)[:lmax, :]                   # (L, K)
    sum_t = jnp.sum(sumt_c, axis=0)[:lmax, 0]                      # (L,)
    sum_p = jnp.sum(jnp.sum(sump_c, axis=0)[:, 0].reshape(b, k), axis=0)      # (K,)
    sum_l1mp = jnp.sum(jnp.sum(suml_c, axis=0)[:, 0].reshape(b, k), axis=0)   # (K,)

    # bce_sum[n,k] = -sum_x [ t*log p + (1-t)*log(1-p) ] = -(ratio[n,k] + sum_log1mp[k])
    bce = -(ratio_s + sum_l1mp[None, :]) / float(npix)
    dice_score = (2.0 * inter + EPS) / (sum_t[:, None] + sum_p[None, :] + EPS)
    loss_mat = (1.0 - dice_score) + bce                            # (L, K)

    # Background term: pred channel 0 vs (target == 0).
    res0 = loss_mat[0, 0]

    # Greedy matching over instance labels (ascending, as torch.unique returns
    # sorted values), removing each selected channel from the pool.
    present = sum_t > 0.0                                          # which labels occur
    avail0 = jnp.ones((k,), dtype=bool).at[0].set(False)

    def body(n, carry):
        res, avail = carry
        masked = jnp.where(avail, loss_mat[n], jnp.inf)
        sel = jnp.argmin(masked)                  # first occurrence on ties, like '<'
        take = jnp.logical_and(present[n], jnp.any(avail))
        res = res + jnp.where(take, masked[sel], 0.0)
        avail = jnp.where(take, avail.at[sel].set(False), avail)
        return res, avail

    res, _ = lax.fori_loop(1, lmax, body, (res0, avail0))

    num_instances = jnp.sum(present[1:].astype(jnp.float32))
    # Reference divides by the number of distinct foreground labels (and would
    # raise for empty targets); guard against NaN instead.
    return res / jnp.maximum(num_instances, 1.0)


# ----------------------------- numpy reference ------------------------------
def _bce_dice_ref(pred, tgt):
    pred = pred.astype(np.float64)
    tgt = tgt.astype(np.float64)
    inter = float((pred * tgt).sum())
    dice = 1.0 - (2.0 * inter + EPS) / (pred.sum() + tgt.sum() + EPS)
    logp = np.maximum(np.log(pred), LOG_CLAMP)
    log1mp = np.maximum(np.log(1.0 - pred), LOG_CLAMP)
    bce = float(-(tgt * logp + (1.0 - tgt) * log1mp).mean())
    return dice + bce


def connect_loss_ref(pred, target):
    pred = np.asarray(pred)
    target = np.asarray(target)
    res = _bce_dice_ref(pred[:, 0:1, :, :], (target == 0))
    k_keys = list(range(1, pred.shape[1]))
    n_keys = [int(v) for v in np.unique(target) if int(v) != 0]
    for n in n_keys:
        tcur = (target == n)
        cur, sel = None, None
        for kk in k_keys:
            tl = _bce_dice_ref(pred[:, kk:kk + 1, :, :], tcur)
            if cur is None or tl < cur:
                cur, sel = tl, kk
        if cur is not None:
            k_keys.remove(sel)
            res += cur
    return res / len(n_keys)


if __name__ == "__main__":
    key = jax.random.PRNGKey(0)
    kp_, kt_ = jax.random.split(key)
    B, K, H, W = 2, 4, 16, 16
    NUM_LABELS = 4  # candidate label values 0..3 (0 = background, 3 instances)

    pred = jax.nn.sigmoid(jax.random.normal(kp_, (B, K, H, W), jnp.float32))
    target = jax.random.randint(kt_, (B, 1, H, W), 0, NUM_LABELS, jnp.int32)

    out = connect_loss(pred, target, num_candidate_labels=NUM_LABELS)
    out = jax.block_until_ready(out)

    ref = connect_loss_ref(np.asarray(pred), np.asarray(target))
    assert abs(float(out) - float(ref)) <= 1e-3 * max(1.0, abs(float(ref))), (float(out), float(ref))

    print("KERNEL_OK")
</pallas_src>

<mosaic_0001>
module attributes {stable_mosaic.version = 11 : i64} {
  func.func @_stats_kernel(%arg0: i32, %arg1: i32, %arg2: memref<8x256xf32, #tpu.memory_space<vmem>>, %arg3: memref<2x256xi32, #tpu.memory_space<vmem>>, %arg4: memref<1x8x4xf32, #tpu.memory_space<vmem>>, %arg5: memref<1x8x4xf32, #tpu.memory_space<vmem>>, %arg6: memref<1x8x1xf32, #tpu.memory_space<vmem>>, %arg7: memref<1x8x1xf32, #tpu.memory_space<vmem>>, %arg8: memref<1x8x1xf32, #tpu.memory_space<vmem>>) attributes {dimension_semantics = [#tpu.dimension_semantics<parallel>, #tpu.dimension_semantics<arbitrary>], iteration_bounds = array<i64: 1, 1>, scalar_prefetch = 0 : i64, scratch_operands = 0 : i64, tpu.core_type = #tpu.core_type<tc>, window_params = [{transform_indices = @transform_0, window_bounds = array<i64: 8, 256>}, {transform_indices = @transform_1, window_bounds = array<i64: 2, 256>}, {transform_indices = @transform_2, window_bounds = array<i64: 1, 8, 4>}, {transform_indices = @transform_3, window_bounds = array<i64: 1, 8, 4>}, {transform_indices = @transform_4, window_bounds = array<i64: 1, 8, 1>}, {transform_indices = @transform_5, window_bounds = array<i64: 1, 8, 1>}, {transform_indices = @transform_6, window_bounds = array<i64: 1, 8, 1>}]} {
    %c0_i32 = arith.constant 0 : i32
    %0 = arith.cmpi eq, %arg1, %c0_i32 : i32
    %1 = arith.extui %0 : i1 to i32
    %c0_i32_0 = arith.constant 0 : i32
    %2 = arith.cmpi ne, %1, %c0_i32_0 : i32
    scf.if %2 {
      %cst_49 = arith.constant 0.000000e+00 : f32
      %96 = vector.broadcast %cst_49 : f32 to vector<1x8x4xf32>
      %c0_50 = arith.constant 0 : index
      %c0_51 = arith.constant 0 : index
      %c0_52 = arith.constant 0 : index
      %97 = vector.load %arg4[%c0_50, %c0_51, %c0_52] : memref<1x8x4xf32, #tpu.memory_space<vmem>>, vector<1x8x4xf32>
      tpu.vector_store %arg4[%c0_50, %c0_51, %c0_52], %96 {strides = array<i32>} : memref<1x8x4xf32, #tpu.memory_space<vmem>>, vector<1x8x4xf32>,
      %cst_53 = arith.constant 0.000000e+00 : f32
      %98 = vector.broadcast %cst_53 : f32 to vector<1x8x4xf32>
      %c0_54 = arith.constant 0 : index
      %c0_55 = arith.constant 0 : index
      %c0_56 = arith.constant 0 : index
      %99 = vector.load %arg5[%c0_54, %c0_55, %c0_56] : memref<1x8x4xf32, #tpu.memory_space<vmem>>, vector<1x8x4xf32>
      tpu.vector_store %arg5[%c0_54, %c0_55, %c0_56], %98 {strides = array<i32>} : memref<1x8x4xf32, #tpu.memory_space<vmem>>, vector<1x8x4xf32>,
      %cst_57 = arith.constant 0.000000e+00 : f32
      %100 = vector.broadcast %cst_57 : f32 to vector<1x8x1xf32>
      %c0_58 = arith.constant 0 : index
      %c0_59 = arith.constant 0 : index
      %c0_60 = arith.constant 0 : index
      %101 = vector.load %arg6[%c0_58, %c0_59, %c0_60] : memref<1x8x1xf32, #tpu.memory_space<vmem>>, vector<1x8x1xf32>
      tpu.vector_store %arg6[%c0_58, %c0_59, %c0_60], %100 {strides = array<i32>} : memref<1x8x1xf32, #tpu.memory_space<vmem>>, vector<1x8x1xf32>,
      %cst_61 = arith.constant 0.000000e+00 : f32
      %102 = vector.broadcast %cst_61 : f32 to vector<1x8x1xf32>
      %c0_62 = arith.constant 0 : index
      %c0_63 = arith.constant 0 : index
      %c0_64 = arith.constant 0 : index
      %103 = vector.load %arg7[%c0_62, %c0_63, %c0_64] : memref<1x8x1xf32, #tpu.memory_space<vmem>>, vector<1x8x1xf32>
      tpu.vector_store %arg7[%c0_62, %c0_63, %c0_64], %102 {strides = array<i32>} : memref<1x8x1xf32, #tpu.memory_space<vmem>>, vector<1x8x1xf32>,
      %cst_65 = arith.constant 0.000000e+00 : f32
      %104 = vector.broadcast %cst_65 : f32 to vector<1x8x1xf32>
      %c0_66 = arith.constant 0 : index
      %c0_67 = arith.constant 0 : index
      %c0_68 = arith.constant 0 : index
      %105 = vector.load %arg8[%c0_66, %c0_67, %c0_68] : memref<1x8x1xf32, #tpu.memory_space<vmem>>, vector<1x8x1xf32>
      tpu.vector_store %arg8[%c0_66, %c0_67, %c0_68], %104 {strides = array<i32>} : memref<1x8x1xf32, #tpu.memory_space<vmem>>, vector<1x8x1xf32>,
    } else {
    }
    %c1_i32 = arith.constant 1 : i32
    %3 = arith.muli %arg0, %c1_i32 : i32
    %4 = arith.addi %3, %arg1 : i32
    %c256_i32 = arith.constant 256 : i32
    %5 = arith.muli %4, %c256_i32 : i32
    %6 = tpu.iota {dimensions = array<i32: 1>} : vector<1x256xi32>
    %7 = vector.broadcast %5 : i32 to vector<1x256xi32>
    %8 = arith.addi %7, %6 : vector<1x256xi32>
    %c256_i32_1 = arith.constant 256 : i32
    %9 = vector.broadcast %c256_i32_1 : i32 to vector<1x256xi32>
    %10 = arith.cmpi slt, %8, %9 : vector<1x256xi32>
    %c0 = arith.constant 0 : index
    %c0_2 = arith.constant 0 : index
    %11 = vector.load %arg2[%c0, %c0_2] : memref<8x256xf32, #tpu.memory_space<vmem>>, vector<8x256xf32>
    %cst = arith.constant 0.000000e+00 : f32
    %12 = vector.shape_cast %10 : vector<1x256xi1> to vector<1x256xi1>
    %13 = vector.broadcast %12 : vector<1x256xi1> to vector<8x256xi1>
    %14 = vector.broadcast %cst : f32 to vector<8x256xf32>
    %15 = arith.select %13, %11, %14 : vector<8x256xi1>, vector<8x256xf32>
    %c0_3 = arith.constant 0 : index
    %c0_4 = arith.constant 0 : index
    %16 = vector.load %arg3[%c0_3, %c0_4] : memref<2x256xi32, #tpu.memory_space<vmem>>, vector<2x256xi32>
    %c-1_i32 = arith.constant -1 : i32
    %17 = vector.shape_cast %10 : vector<1x256xi1> to vector<1x256xi1>
    %18 = vector.broadcast %17 : vector<1x256xi1> to vector<2x256xi1>
    %19 = vector.broadcast %c-1_i32 : i32 to vector<2x256xi32>
    %20 = arith.select %18, %16, %19 : vector<2x256xi1>, vector<2x256xi32>
    %21 = math.log %15 : vector<8x256xf32>
    %cst_5 = arith.constant -1.000000e+02 : f32
    %22 = vector.broadcast %cst_5 : f32 to vector<8x256xf32>
    %23 = arith.maximumf %21, %22 : vector<8x256xf32>
    %cst_6 = arith.constant 1.000000e+00 : f32
    %24 = vector.broadcast %cst_6 : f32 to vector<8x256xf32>
    %25 = arith.subf %24, %15 : vector<8x256xf32>
    %26 = math.log %25 : vector<8x256xf32>
    %cst_7 = arith.constant -1.000000e+02 : f32
    %27 = vector.broadcast %cst_7 : f32 to vector<8x256xf32>
    %28 = arith.maximumf %26, %27 : vector<8x256xf32>
    %29 = arith.subf %23, %28 : vector<8x256xf32>
    %30 = tpu.iota {dimensions = array<i32: 0>} : vector<8x256xi32>
    %cst_8 = arith.constant 0.000000e+00 : f32
    %31 = vector.broadcast %cst_8 : f32 to vector<8x4xf32>
    %cst_9 = arith.constant 0.000000e+00 : f32
    %32 = vector.broadcast %cst_9 : f32 to vector<8x4xf32>
    %cst_10 = arith.constant 0.000000e+00 : f32
    %33 = vector.broadcast %cst_10 : f32 to vector<8x1xf32>
    %34 = vector.extract_strided_slice %20 {offsets = [0, 0], sizes = [1, 256], strides = [1, 1]} : vector<2x256xi32> to vector<1x256xi32>
    %35 = vector.broadcast %34 : vector<1x256xi32> to vector<8x256xi32>
    %36 = arith.cmpi eq, %30, %35 : vector<8x256xi32>
    %37 = arith.extui %36 : vector<8x256xi1> to vector<8x256xi32>
    %38 = arith.sitofp %37 : vector<8x256xi32> to vector<8x256xf32>
    %39 = vector.extract_strided_slice %15 {offsets = [0, 0], sizes = [4, 256], strides = [1, 1]} : vector<8x256xf32> to vector<4x256xf32>
    %40 = vector.extract_strided_slice %29 {offsets = [0, 0], sizes = [4, 256], strides = [1, 1]} : vector<8x256xf32> to vector<4x256xf32>
    %cst_11 = arith.constant dense<0.000000e+00> : vector<8x4xf32>
    %41 = tpu.matmul %38, %39, %cst_11 {dimension_numbers = #tpu.dot_dimension_numbers<[1], [1], [0], [0], [0, 0, 1, 0], [], []>} : vector<8x256xf32>, vector<4x256xf32>, vector<8x4xf32> -> vector<8x4xf32>
    %42 = arith.addf %31, %41 : vector<8x4xf32>
    %cst_12 = arith.constant dense<0.000000e+00> : vector<8x4xf32>
    %43 = tpu.matmul %38, %40, %cst_12 {dimension_numbers = #tpu.dot_dimension_numbers<[1], [1], [0], [0], [0, 0, 1, 0], [], []>} : vector<8x256xf32>, vector<4x256xf32>, vector<8x4xf32> -> vector<8x4xf32>
    %44 = arith.addf %32, %43 : vector<8x4xf32>
    %cst_13 = arith.constant dense<0.000000e+00> : vector<8xf32>
    %45 = vector.multi_reduction <add>, %38, %cst_13 [1] : vector<8x256xf32> to vector<8xf32>
    %46 = vector.shape_cast %45 : vector<8xf32> to vector<8x1xf32>
    %47 = arith.addf %33, %46 : vector<8x1xf32>
    %48 = vector.extract_strided_slice %20 {offsets = [1, 0], sizes = [1, 256], strides = [1, 1]} : vector<2x256xi32> to vector<1x256xi32>
    %49 = vector.broadcast %48 : vector<1x256xi32> to vector<8x256xi32>
    %50 = arith.cmpi eq, %30, %49 : vector<8x256xi32>
    %51 = arith.extui %50 : vector<8x256xi1> to vector<8x256xi32>
    %52 = arith.sitofp %51 : vector<8x256xi32> to vector<8x256xf32>
    %53 = vector.extract_strided_slice %15 {offsets = [4, 0], sizes = [4, 256], strides = [1, 1]} : vector<8x256xf32> to vector<4x256xf32>
    %54 = vector.extract_strided_slice %29 {offsets = [4, 0], sizes = [4, 256], strides = [1, 1]} : vector<8x256xf32> to vector<4x256xf32>
    %cst_14 = arith.constant dense<0.000000e+00> : vector<8x4xf32>
    %55 = tpu.matmul %52, %53, %cst_14 {dimension_numbers = #tpu.dot_dimension_numbers<[1], [1], [0], [0], [0, 0, 1, 0], [], []>} : vector<8x256xf32>, vector<4x256xf32>, vector<8x4xf32> -> vector<8x4xf32>
    %56 = arith.addf %42, %55 : vector<8x4xf32>
    %cst_15 = arith.constant dense<0.000000e+00> : vector<8x4xf32>
    %57 = tpu.matmul %52, %54, %cst_15 {dimension_numbers = #tpu.dot_dimension_numbers<[1], [1], [0], [0], [0, 0, 1, 0], [], []>} : vector<8x256xf32>, vector<4x256xf32>, vector<8x4xf32> -> vector<8x4xf32>
    %58 = arith.addf %44, %57 : vector<8x4xf32>
    %cst_16 = arith.constant dense<0.000000e+00> : vector<8xf32>
    %59 = vector.multi_reduction <add>, %52, %cst_16 [1] : vector<8x256xf32> to vector<8xf32>
    %60 = vector.shape_cast %59 : vector<8xf32> to vector<8x1xf32>
    %61 = arith.addf %47, %60 : vector<8x1xf32>
    %c0_17 = arith.constant 0 : index
    %c0_18 = arith.constant 0 : index
    %c0_19 = arith.constant 0 : index
    %62 = vector.load %arg4[%c0_17, %c0_18, %c0_19] : memref<1x8x4xf32, #tpu.memory_space<vmem>>, vector<1x8x4xf32>
    %63 = vector.shape_cast %62 : vector<1x8x4xf32> to vector<8x4xf32>
    %64 = arith.addf %63, %56 : vector<8x4xf32>
    %c0_20 = arith.constant 0 : index
    %c0_21 = arith.constant 0 : index
    %c0_22 = arith.constant 0 : index
    %65 = vector.load %arg4[%c0_20, %c0_21, %c0_22] : memref<1x8x4xf32, #tpu.memory_space<vmem>>, vector<1x8x4xf32>
    %66 = vector.shape_cast %65 : vector<1x8x4xf32> to vector<8x4xf32>
    %67 = vector.shape_cast %64 : vector<8x4xf32> to vector<1x8x4xf32>
    tpu.vector_store %arg4[%c0_20, %c0_21, %c0_22], %67 {strides = array<i32>} : memref<1x8x4xf32, #tpu.memory_space<vmem>>, vector<1x8x4xf32>,
    %c0_23 = arith.constant 0 : index
    %c0_24 = arith.constant 0 : index
    %c0_25 = arith.constant 0 : index
    %68 = vector.load %arg5[%c0_23, %c0_24, %c0_25] : memref<1x8x4xf32, #tpu.memory_space<vmem>>, vector<1x8x4xf32>
    %69 = vector.shape_cast %68 : vector<1x8x4xf32> to vector<8x4xf32>
    %70 = arith.addf %69, %58 : vector<8x4xf32>
    %c0_26 = arith.constant 0 : index
    %c0_27 = arith.constant 0 : index
    %c0_28 = arith.constant 0 : index
    %71 = vector.load %arg5[%c0_26, %c0_27, %c0_28] : memref<1x8x4xf32, #tpu.memory_space<vmem>>, vector<1x8x4xf32>
    %72 = vector.shape_cast %71 : vector<1x8x4xf32> to vector<8x4xf32>
    %73 = vector.shape_cast %70 : vector<8x4xf32> to vector<1x8x4xf32>
    tpu.vector_store %arg5[%c0_26, %c0_27, %c0_28], %73 {strides = array<i32>} : memref<1x8x4xf32, #tpu.memory_space<vmem>>, vector<1x8x4xf32>,
    %c0_29 = arith.constant 0 : index
    %c0_30 = arith.constant 0 : index
    %c0_31 = arith.constant 0 : index
    %74 = vector.load %arg6[%c0_29, %c0_30, %c0_31] : memref<1x8x1xf32, #tpu.memory_space<vmem>>, vector<1x8x1xf32>
    %75 = vector.shape_cast %74 : vector<1x8x1xf32> to vector<8x1xf32>
    %76 = arith.addf %75, %61 : vector<8x1xf32>
    %c0_32 = arith.constant 0 : index
    %c0_33 = arith.constant 0 : index
    %c0_34 = arith.constant 0 : index
    %77 = vector.load %arg6[%c0_32, %c0_33, %c0_34] : memref<1x8x1xf32, #tpu.memory_space<vmem>>, vector<1x8x1xf32>
    %78 = vector.shape_cast %77 : vector<1x8x1xf32> to vector<8x1xf32>
    %79 = vector.shape_cast %76 : vector<8x1xf32> to vector<1x8x1xf32>
    tpu.vector_store %arg6[%c0_32, %c0_33, %c0_34], %79 {strides = array<i32>} : memref<1x8x1xf32, #tpu.memory_space<vmem>>, vector<1x8x1xf32>,
    %c0_35 = arith.constant 0 : index
    %c0_36 = arith.constant 0 : index
    %c0_37 = arith.constant 0 : index
    %80 = vector.load %arg7[%c0_35, %c0_36, %c0_37] : memref<1x8x1xf32, #tpu.memory_space<vmem>>, vector<1x8x1xf32>
    %81 = vector.shape_cast %80 : vector<1x8x1xf32> to vector<8x1xf32>
    %cst_38 = arith.constant dense<0.000000e+00> : vector<8xf32>
    %82 = vector.multi_reduction <add>, %15, %cst_38 [1] : vector<8x256xf32> to vector<8xf32>
    %83 = vector.shape_cast %82 : vector<8xf32> to vector<8x1xf32>
    %84 = arith.addf %81, %83 : vector<8x1xf32>
    %c0_39 = arith.constant 0 : index
    %c0_40 = arith.constant 0 : index
    %c0_41 = arith.constant 0 : index
    %85 = vector.load %arg7[%c0_39, %c0_40, %c0_41] : memref<1x8x1xf32, #tpu.memory_space<vmem>>, vector<1x8x1xf32>
    %86 = vector.shape_cast %85 : vector<1x8x1xf32> to vector<8x1xf32>
    %87 = vector.shape_cast %84 : vector<8x1xf32> to vector<1x8x1xf32>
    tpu.vector_store %arg7[%c0_39, %c0_40, %c0_41], %87 {strides = array<i32>} : memref<1x8x1xf32, #tpu.memory_space<vmem>>, vector<1x8x1xf32>,
    %c0_42 = arith.constant 0 : index
    %c0_43 = arith.constant 0 : index
    %c0_44 = arith.constant 0 : index
    %88 = vector.load %arg8[%c0_42, %c0_43, %c0_44] : memref<1x8x1xf32, #tpu.memory_space<vmem>>, vector<1x8x1xf32>
    %89 = vector.shape_cast %88 : vector<1x8x1xf32> to vector<8x1xf32>
    %cst_45 = arith.constant dense<0.000000e+00> : vector<8xf32>
    %90 = vector.multi_reduction <add>, %28, %cst_45 [1] : vector<8x256xf32> to vector<8xf32>
    %91 = vector.shape_cast %90 : vector<8xf32> to vector<8x1xf32>
    %92 = arith.addf %89, %91 : vector<8x1xf32>
    %c0_46 = arith.constant 0 : index
    %c0_47 = arith.constant 0 : index
    %c0_48 = arith.constant 0 : index
    %93 = vector.load %arg8[%c0_46, %c0_47, %c0_48] : memref<1x8x1xf32, #tpu.memory_space<vmem>>, vector<1x8x1xf32>
    %94 = vector.shape_cast %93 : vector<1x8x1xf32> to vector<8x1xf32>
    %95 = vector.shape_cast %92 : vector<8x1xf32> to vector<1x8x1xf32>
    tpu.vector_store %arg8[%c0_46, %c0_47, %c0_48], %95 {strides = array<i32>} : memref<1x8x1xf32, #tpu.memory_space<vmem>>, vector<1x8x1xf32>,
    return
  }
  func.func @transform_0(%arg0: i32, %arg1: i32) -> (i32, i32) {
    %c1_i32 = arith.constant 1 : i32
    %0 = arith.muli %arg0, %c1_i32 : i32
    %1 = arith.addi %0, %arg1 : i32
    %c0_i32 = arith.constant 0 : i32
    %2 = arith.minsi %1, %c0_i32 : i32
    %c0_i32_0 = arith.constant 0 : i32
    %c0_i32_1 = arith.constant 0 : i32
    return %c0_i32_0, %2 : i32, i32
  }
  func.func @transform_1(%arg0: i32, %arg1: i32) -> (i32, i32) {
    %c1_i32 = arith.constant 1 : i32
    %0 = arith.muli %arg0, %c1_i32 : i32
    %1 = arith.addi %0, %arg1 : i32
    %c0_i32 = arith.constant 0 : i32
    %2 = arith.minsi %1, %c0_i32 : i32
    %c0_i32_0 = arith.constant 0 : i32
    %c0_i32_1 = arith.constant 0 : i32
    return %c0_i32_0, %2 : i32, i32
  }
  func.func @transform_2(%arg0: i32, %arg1: i32) -> (i32, i32, i32) {
    %c0_i32 = arith.constant 0 : i32
    %c0_i32_0 = arith.constant 0 : i32
    %c0_i32_1 = arith.constant 0 : i32
    return %arg0, %c0_i32, %c0_i32_0 : i32, i32, i32
  }
  func.func @transform_3(%arg0: i32, %arg1: i32) -> (i32, i32, i32) {
    %c0_i32 = arith.constant 0 : i32
    %c0_i32_0 = arith.constant 0 : i32
    %c0_i32_1 = arith.constant 0 : i32
    return %arg0, %c0_i32, %c0_i32_0 : i32, i32, i32
  }
  func.func @transform_4(%arg0: i32, %arg1: i32) -> (i32, i32, i32) {
    %c0_i32 = arith.constant 0 : i32
    %c0_i32_0 = arith.constant 0 : i32
    %c0_i32_1 = arith.constant 0 : i32
    return %arg0, %c0_i32, %c0_i32_0 : i32, i32, i32
  }
  func.func @transform_5(%arg0: i32, %arg1: i32) -> (i32, i32, i32) {
    %c0_i32 = arith.constant 0 : i32
    %c0_i32_0 = arith.constant 0 : i32
    %c0_i32_1 = arith.constant 0 : i32
    return %arg0, %c0_i32, %c0_i32_0 : i32, i32, i32
  }
  func.func @transform_6(%arg0: i32, %arg1: i32) -> (i32, i32, i32) {
    %c0_i32 = arith.constant 0 : i32
    %c0_i32_0 = arith.constant 0 : i32
    %c0_i32_1 = arith.constant 0 : i32
    return %arg0, %c0_i32, %c0_i32_0 : i32, i32, i32
  }
}

</mosaic_0001>

<bundles_post_ra>
// kernel: squeeze.11
= control target key start
LH: loop header
LB: loop body
LE: loop exit
PB: predicated region body
PF: predicated region fallthrough
CT: control target
= control target key end

     0   :  { %vm7_vm0 = vcmask 31744   ;;  %s39_s0 = inlined_call_operand.vmem [shape: f32[8], index: 0, kind: input, shape index: {}]   ;;  %s40_s1 = inlined_call_operand.vmem [shape: f32[2,4], index: 1, kind: output, shape index: {}]  }
   0x1   :  { %v4_v0 = vld [vmem:[%s39_s0] sm:$0x1]  ;;  %s22_s0 = smov 124  }
   0x2   :  { %5 = vst [vmem:[#allocation1] sm:$0x1] %v4_v0 }
   0x9   :  { %v9_v1 = vld [vmem:[#allocation1] sm:$0x1]  }
   0xa   :  { %v6_v2 = vld [vmem:[#allocation1] sm:$0x1]   ;;  %10 = vrot.lane.b32.xlu0 %v9_v1, %s22_s0 }
   0xb   :  { %8 = vst.msk [vmem:[#allocation0] sm:$0x1] %vm7_vm0, %v6_v2  }
  0x7c   :  { %v11_v3 = vpop.permute.xlu0 %10  }
  0x7d   :  { %14 = vst.msk [vmem:[#allocation0 + $0x1] sm:$0x1] %vm7_vm0, %v11_v3  }
  0x84   :  { %v18_v4 = vld [vmem:[#allocation0] sm:$0x3] }
  0x85   :  { %20 = vst [vmem:[%s40_s1] sm:$0x3] %v18_v4 }

// kernel: _connect_loss.1
= control target key start
LH: loop header
LB: loop body
LE: loop exit
PB: predicated region body
PF: predicated region fallthrough
CT: control target
= control target key end

     0   :  { %v136_v0 = vlaneseq  ;;  %v544_v17 = vmov 1.0   ;;  %v545_v18 = vmov 0.0   ;;  %vm84_vm4 = vcmask 31744   ;;  %s657_s0 = inlined_call_operand.vmem [shape: f32[8,256], index: 0, kind: input, shape index: {}]   ;;  %s658_s1 = inlined_call_operand.vmem [shape: s32[2,256], index: 1, kind: input, shape index: {}]   ;;  %s659_s2 = inlined_call_operand.vmem [shape: f32[1,8,4], index: 2, kind: output, shape index: {0}]   ;;  %s660_s4 = inlined_call_operand.vmem [shape: f32[1,8,1], index: 4, kind: output, shape index: {2}]   ;;  %s661_s5 = inlined_call_operand.vmem [shape: f32[1,8,1], index: 5, kind: output, shape index: {3}]   ;;  %s662_s3 = inlined_call_operand.vmem [shape: f32[1,8,4], index: 3, kind: output, shape index: {1}]   ;;  %s663_s6 = inlined_call_operand.vmem [shape: f32[1,8,1], index: 6, kind: output, shape index: {4}]  }
   0x1   :  { %v102_v1 = vld [vmem:[%s657_s0 + $0x8] sm:$0xff]  ;;  %v101_v2 = vld [vmem:[%s657_s0] sm:$0xff]  ;;  %85 = vst.msk [vmem:[%s659_s2] sm:$0xff] %vm84_vm4, %v545_v18  ;;  %vm87_vm5 = vcmask 7168   ;;  %86 = vst.msk [vmem:[%s662_s3] sm:$0xff] %vm84_vm4, %v545_v18 }
   0x2   :  { %v521_v3 = vld.sshfl [vmem:[%s658_s1] sm:$0x33 pattern:$0x76325410]  ;;  %v173_v4 = vrot.slane %v102_v1, 4  ;;  %246 = vmatprep.subr.mxu1 %v102_v1  ;;  %536 = vlog2.f32 %v101_v2  ;;  %v126_v5 = vsub.f32 1.0, %v101_v2  ;;  %v478_v10 = vadd.f32 %v102_v1, %v101_v2 }
   0x3   :  { %v172_v6 = vrot.slane %v101_v2, 4  ;;  %247 = vmatpush1.xpose.msra.mxu1 %v101_v2  ;;  %v117_v7 = vcombine.high %v521_v3, %v521_v3  ;;  %v137_v8 = vshrl.u32 %v136_v0, 7  ;;  %538 = vlog2.f32 %v102_v1  ;;  %88 = vst.msk [vmem:[%s660_s4] sm:$0xff] %vm87_vm5, %v545_v18  ;;  %89 = vst.msk [vmem:[%s661_s5] sm:$0xff] %vm87_vm5, %v545_v18 }
   0x4   :  { %v127_v9 = vsub.f32 1.0, %v102_v1  ;;  %176 = vmatprep.subr.mxu0 %v173_v4  ;;  %540 = vlog2.f32 %v126_v5  ;;  %479 = vadd.xlane.f32.xlu1 %v478_v10  ;;  %90 = vst.msk [vmem:[%s663_s6] sm:$0xff] %vm87_vm5, %v545_v18 }
   0x5   :  { %177 = vmatpush1.xpose.msra.mxu0 %v172_v6  ;;  %v158_v11 = vsub.s32 1, %v137_v8  ;;  %v140_v12 = vsub.s32 0, %v137_v8 }
   0x6   :  { %542 = vlog2.f32 %v127_v9 }
   0x7   :  { %v163_v13 = vrot.slane %v117_v7, %v158_v11  ;;  %v145_v14 = vrot.slane %v117_v7, %v140_v12  ;;  %v159_v15 = vrot.slane %v521_v3, %v158_v11  ;;  %v141_v16 = vrot.slane %v521_v3, %v140_v12 }
   0x8   :  { %v466_v55 = vld [vmem:[%s659_s2] sm:$0xff] }
   0x9   :  { %vm165_vm0 = vcmp.eq.s32.totalorder %v137_v8, %v163_v13  ;;  %vm147_vm1 = vcmp.eq.s32.totalorder %v137_v8, %v145_v14  ;;  %vm164_vm2 = vcmp.eq.s32.totalorder %v137_v8, %v159_v15  ;;  %vm146_vm3 = vcmp.eq.s32.totalorder %v137_v8, %v141_v16  ;;  %v470_v63 = vld [vmem:[%s662_s3] sm:$0xff] }
   0xa   :  { %526 = vmatprep.mubr.msk.f32.mxu0 %vm165_vm0, %v544_v17  ;;  %528 = vmatprep.mubr.msk.f32.mxu1 %vm147_vm1, %v544_v17  ;;  %v522_v19 = vsel %vm146_vm3, 1.0, %v545_v18  ;;  %v523_v20 = vsel %vm147_vm1, 1.0, %v545_v18  ;;  %v524_v21 = vsel %vm164_vm2, 1.0, %v545_v18  ;;  %v525_v22 = vsel %vm165_vm0, 1.0, %v545_v18  ;;  %v477_v42 = vld [vmem:[%s661_s5] sm:$0xff] }
   0xb   :  { %527 = vmatmul.mubr.msk.f32.vlgmr.msra.gmra.mrb[0].mxu0 %vm164_vm2, %v544_v17  ;;  %529 = vmatmul.mubr.msk.f32.vlgmr.msra.gmra.mrb[0].mxu1 %vm146_vm3, %v544_v17  ;;  %v152_v23 = vadd.f32 %v523_v20, %v522_v19  ;;  %v462_v27 = vadd.f32 %v525_v22, %v524_v21  ;;  %v473_v46 = vld [vmem:[%s660_s4] sm:$0xff] }
   0xc   :  { %v537_v24 = vpop.eup %536  ;;  %530 = vmatprep.mubr.msk.f32.mxu0 %vm165_vm0, %v544_v17  ;;  %532 = vmatprep.mubr.msk.f32.mxu1 %vm147_vm1, %v544_v17  ;;  %v483_v50 = vld [vmem:[%s663_s6] sm:$0xff] }
   0xd   :  { %v539_v25 = vpop.eup %538  ;;  %v121_v26 = vmul.f32 0.6931472, %v537_v24  ;;  %153 = vadd.xlane.f32.xlu0 %v152_v23 }
   0xe   :  { %v541_v28 = vpop.eup %540  ;;  %v123_v29 = vmul.f32 0.6931472, %v539_v25 }
   0xf   :  { %v124_v31 = vmax.f32 %v121_v26, -100.0  ;;  %v129_v32 = vmul.f32 0.6931472, %v541_v28 }
  0x10   :  { %v543_v30 = vpop.eup %542  ;;  %v125_v33 = vmax.f32 %v123_v29, -100.0 }
  0x11   :  { %v131_v34 = vmul.f32 0.6931472, %v543_v30  ;;  %v132_v35 = vmax.f32 %v129_v32, -100.0  ;;  %463 = vadd.xlane.f32.xlu0 %v462_v27 }
  0x13   :  { %v133_v36 = vmax.f32 %v131_v34, -100.0  ;;  %v134_v37 = vsub.f32 %v124_v31, %v132_v35 }
  0x15   :  { %v135_v38 = vsub.f32 %v125_v33, %v133_v36  ;;  %v484_v39 = vadd.f32 %v133_v36, %v132_v35  ;;  %v318_v40 = vrot.slane %v134_v37, 4 }
  0x17   :  { %v319_v41 = vrot.slane %v135_v38, 4  ;;  %392 = vmatprep.subr.mxu1 %v135_v38  ;;  %485 = vadd.xlane.f32.xlu1 %v484_v39 }
  0x18   :  { %393 = vmatpush1.xpose.msra.mxu1 %v134_v37 }
  0x19   :  { %322 = vmatprep.subr.mxu0 %v319_v41 }
  0x1a   :  { %323 = vmatpush1.xpose.msra.mxu0 %v318_v40 }
  0x1b   :  { %533 = vmatmul.mubr.msk.f32.vlgmr.msra.gmra.mrb[2].mxu1 %vm146_vm3, %v544_v17 }
  0x1d   :  { %531 = vmatmul.mubr.msk.f32.vlgmr.msra.gmra.mrb[2].mxu0 %vm164_vm2, %v544_v17 }
  0x91   :  { %v480_v43 = vpop.xlane.xlu1 %479 }
  0x92   :  { %v481_v44 = vadd.f32 %v480_v43, %v477_v42 }
  0x94   :  { %482 = vst.msk [vmem:[%s661_s5] sm:$0xff] %vm87_vm5, %v481_v44 }
  0x9a   :  { %v154_v45 = vpop.xlane.xlu0 %153 }
  0x9e   :  { %v464_v47 = vpop.xlane.xlu0 %463 }
  0x9f   :  { %v465_v48 = vadd.f32 %v464_v47, %v154_v45 }
  0xa1   :  { %v474_v49 = vadd.f32 %v473_v46, %v465_v48 }
  0xa3   :  { %476 = vst.msk [vmem:[%s660_s4] sm:$0xff] %vm87_vm5, %v474_v49 }
  0xa4   :  { %v486_v51 = vpop.xlane.xlu1 %485 }
  0xa5   :  { %v487_v52 = vadd.f32 %v486_v51, %v483_v50 }
  0xa7   :  { %488 = vst.msk [vmem:[%s663_s6] sm:$0xff] %vm87_vm5, %v487_v52 }
  0xde   :  { %v242_v53 = vpop.f32.mrb[0].mxu0  ;;  %v312_v54 = vpop.f32.mrb[0].mxu1 }
  0xdf   :  { %v313_v56 = vadd.f32 %v312_v54, %v242_v53  ;;  %v244_v57 = vpop.f32.mrb[1].mxu0  ;;  %v314_v58 = vpop.f32.mrb[1].mxu1 }
  0xe1   :  { %v467_v59 = vadd.f32 %v466_v55, %v313_v56 }
  0xe3   :  { %469 = vst.msk [vmem:[%s659_s2] sm:$0xff] %vm84_vm4, %v467_v59 }
  0xee   :  { %v458_v60 = vpop.f32.mrb[2].mxu1 }
  0xef   :  { %v460_v61 = vpop.f32.mrb[3].mxu1 }
  0xf0   :  { %v388_v62 = vpop.f32.mrb[2].mxu0 }
  0xf1   :  { %v459_v0 = vadd.f32 %v458_v60, %v388_v62  ;;  %v390_v1 = vpop.f32.mrb[3].mxu0 }
  0xf3   :  { %v471_v2 = vadd.f32 %v470_v63, %v459_v0 }
  0xf5   :  { %472 = vst.msk [vmem:[%s662_s3] sm:$0xff] %vm84_vm4, %v471_v2 }

</bundles_post_ra>
